<compile_context>
chip_gen: v5e
topology: v5e:2x2
jax: 0.10.0
libtpu: 0.0.40
codegen_flags: <defaults>
</compile_context>

<pallas_src>
import math

import jax
import jax.numpy as jnp
from jax.experimental import pallas as pl
from jax.experimental.pallas import tpu as pltpu


def make_sine_pe(dim: int, max_len: int = 1024, dtype=jnp.float32) -> jnp.ndarray:
    """Deterministic 'sine_frozen' positional-encoding table, shape [1, max_len, dim]."""
    rest = dim % 2
    d = dim + rest
    position = jnp.arange(0, max_len, dtype=jnp.float32)[:, None]              # [max_len, 1]
    div_term = jnp.exp(jnp.arange(0, d, 2, dtype=jnp.float32)
                       * (-math.log(10000.0) / d))                             # [d//2]
    pe = jnp.zeros((max_len, d), dtype=jnp.float32)
    pe = pe.at[:, 0::2].set(jnp.sin(position * div_term))
    pe = pe.at[:, 1::2].set(jnp.cos(position * div_term))
    pe = pe[:, :dim]
    return pe[None].astype(dtype)                                              # [1, max_len, dim]


def _block_budget():
    """(max_block_bytes, vmem_limit_bytes-or-None) based on the local chip."""
    try:
        kind = jax.devices()[0].device_kind.lower()
    except Exception:
        kind = ""
    if "v7" in kind:
        # 2 streamed arrays x 2 buffers x 8 MiB = 32 MiB (+ tiny pe) < 40 MiB,
        # safely under v7x's 64 MiB physical VMEM.
        return 8 * 1024 * 1024, 40 * 1024 * 1024
    # v5e/v6e: 4 MiB blocks sit at the measured roofline knee; default scoped
    # VMEM (32 MiB) already covers 2 x 2 x 4 MiB.
    return 4 * 1024 * 1024, None


def _choose_tiles(B: int, C: int, itemsize: int, max_block_bytes: int):
    """Pick (tile_b, tile_c) for the flattened [B, C] view.

    tile_c: multiple of 128 dividing C (or full C); tile_b: multiple of the
    dtype's sublane-packing factor dividing B (or full B); block <= budget
    whenever the divisor structure allows it.
    """
    sub = max(8, 32 // itemsize)  # f32: 8, bf16: 16, int8/fp8: 32

    def divisors_desc(n):
        return [d for d in range(n, 0, -1) if n % d == 0]

    # Lane (last) dim first: keep it as large as possible while a minimal-height
    # block still fits the budget.
    tile_c = C
    if C % 128 == 0 and C * min(B, sub) * itemsize > max_block_bytes:
        for d in divisors_desc(C):
            if d % 128 == 0 and d * min(B, sub) * itemsize <= max_block_bytes:
                tile_c = d
                break

    # Sublane (row) dim: full B if small / fits; otherwise the largest
    # packing-aligned divisor within budget.
    tile_b = B
    if B > sub and B * tile_c * itemsize > max_block_bytes:
        for d in divisors_desc(B):
            if d % sub == 0 and d * tile_c * itemsize <= max_block_bytes:
                tile_b = d
                break
    return tile_b, tile_c


def _pe_add_kernel(x_ref, pe_ref, o_ref):
    # x_ref/o_ref: VMEM block [tile_b, tile_c]; pe_ref: VMEM block [1, tile_c].
    # Sublane broadcast of the pe row over the batch rows + one VPU add.
    o_ref[...] = x_ref[...] + pe_ref[...]


def positional_encoding_forward(x: jnp.ndarray, pe: jnp.ndarray, start: int = 0) -> jnp.ndarray:
    """x: [B, T, D], pe: [1, max_len, D] -> x + pe[:, start:start+T, :]."""
    B, T, D = x.shape
    max_len, Dp = pe.shape[-2], pe.shape[-1]
    assert D == Dp
    assert isinstance(start, int), "only static `start` is supported"
    assert 0 <= start and start + T <= max_len

    C = T * D
    # Static window slice, cast to the compute dtype, lane-dense flatten.
    pe_win = pe[:, start:start + T, :].astype(x.dtype).reshape(1, C)   # [1, T*D]
    x2d = x.reshape(B, C)                                              # [B, T*D]

    itemsize = jnp.dtype(x.dtype).itemsize
    max_block_bytes, vmem_limit = _block_budget()
    tile_b, tile_c = _choose_tiles(B, C, itemsize, max_block_bytes)
    grid = (B // tile_b, C // tile_c)

    cp_kwargs = dict(dimension_semantics=("parallel", "parallel"))
    if vmem_limit is not None:
        cp_kwargs["vmem_limit_bytes"] = vmem_limit

    out2d = pl.pallas_call(
        _pe_add_kernel,
        out_shape=jax.ShapeDtypeStruct((B, C), x.dtype),
        grid=grid,
        in_specs=[
            pl.BlockSpec((tile_b, tile_c), lambda b, c: (b, c)),   # x (auto-pipelined)
            pl.BlockSpec((1, tile_c), lambda b, c: (0, c)),        # pe window (auto-pipelined)
        ],
        out_specs=pl.BlockSpec((tile_b, tile_c), lambda b, c: (b, c)),
        input_output_aliases={0: 0},   # out reuses x2d's buffer when donated
        compiler_params=pltpu.CompilerParams(**cp_kwargs),
    )(x2d, pe_win)

    return out2d.reshape(B, T, D)


if __name__ == "__main__":
    # Small shapes consistent with the module: batch=2, seq=8, hidden=32.
    B, T, D = 2, 8, 32
    max_len = 1024
    start = 3

    key = jax.random.PRNGKey(0)
    x = jax.random.normal(key, (B, T, D), dtype=jnp.float32)

    pe = make_sine_pe(D, max_len=max_len)

    out = positional_encoding_forward(x, pe, start=start)
    out = jax.block_until_ready(out)

    # Reference (pure JAX) check of the forward semantics.
    ref = x + pe[:, start:start + T, :].astype(x.dtype)
    assert out.shape == x.shape and out.dtype == x.dtype
    assert jnp.allclose(out, ref, atol=1e-6, rtol=1e-6)

    print("KERNEL_OK")
</pallas_src>

<mosaic_0001>
module attributes {stable_mosaic.version = 11 : i64} {
  func.func @_pe_add_kernel(%arg0: i32, %arg1: i32, %arg2: memref<2x256xf32, #tpu.memory_space<vmem>>, %arg3: memref<1x256xf32, #tpu.memory_space<vmem>>, %arg4: memref<2x256xf32, #tpu.memory_space<vmem>>) attributes {dimension_semantics = [#tpu.dimension_semantics<parallel>, #tpu.dimension_semantics<parallel>], iteration_bounds = array<i64: 1, 1>, scalar_prefetch = 0 : i64, scratch_operands = 0 : i64, tpu.core_type = #tpu.core_type<tc>, window_params = [{transform_indices = @transform_0, window_bounds = array<i64: 2, 256>}, {transform_indices = @transform_1, window_bounds = array<i64: 1, 256>}, {transform_indices = @transform_2, window_bounds = array<i64: 2, 256>}]} {
    %c0 = arith.constant 0 : index
    %c0_0 = arith.constant 0 : index
    %0 = vector.load %arg2[%c0, %c0_0] : memref<2x256xf32, #tpu.memory_space<vmem>>, vector<2x256xf32>
    %c0_1 = arith.constant 0 : index
    %c0_2 = arith.constant 0 : index
    %1 = vector.load %arg3[%c0_1, %c0_2] : memref<1x256xf32, #tpu.memory_space<vmem>>, vector<1x256xf32>
    %2 = vector.broadcast %1 : vector<1x256xf32> to vector<2x256xf32>
    %3 = arith.addf %0, %2 : vector<2x256xf32>
    %c0_3 = arith.constant 0 : index
    %c0_4 = arith.constant 0 : index
    %4 = vector.load %arg4[%c0_3, %c0_4] : memref<2x256xf32, #tpu.memory_space<vmem>>, vector<2x256xf32>
    tpu.vector_store %arg4[%c0_3, %c0_4], %3 {strides = array<i32>} : memref<2x256xf32, #tpu.memory_space<vmem>>, vector<2x256xf32>,
    return
  }
  func.func @transform_0(%arg0: i32, %arg1: i32) -> (i32, i32) {
    %c0_i32 = arith.constant 0 : i32
    return %arg0, %arg1 : i32, i32
  }
  func.func @transform_1(%arg0: i32, %arg1: i32) -> (i32, i32) {
    %c0_i32 = arith.constant 0 : i32
    %c0_i32_0 = arith.constant 0 : i32
    return %c0_i32, %arg1 : i32, i32
  }
  func.func @transform_2(%arg0: i32, %arg1: i32) -> (i32, i32) {
    %c0_i32 = arith.constant 0 : i32
    return %arg0, %arg1 : i32, i32
  }
}

</mosaic_0001>

<bundles_post_ra>
// kernel: tpu_custom_call.1
= control target key start
LH: loop header
LB: loop body
LE: loop exit
PB: predicated region body
PF: predicated region fallthrough
CT: control target
= control target key end

     0   :  { %7 = vsyncpa [#allocation3], 0  ;;  %s134_s0 = inlined_call_operand.hbm [shape: f32[2,256], index: 0, kind: input, shape index: {}, may-alias: {0,2}]   ;;  %s135_s1 = inlined_call_operand.vmem [shape: f32[1,256], index: 1, kind: input, shape index: {}]   ;;  %s136_s2 = inlined_call_operand.hbm [shape: f32[2,256], index: 2, kind: output, shape index: {}, may-alias: {0,2}]  }
   0x1   :  { %8 = vsyncpa [#allocation4], 0  ;;  %s14_s11 = sshll.u32 %s134_s0, 4  ;;  %s108_s12 = smov [#allocation2]   ;;  %s15_s11 = int_to_ptr.hbm [resolvable:$true] %s14_s11 }
   0x2   :  { %s16_s13 = sshll.u32 %s108_s12, 4  ;;  %s17_s13 = int_to_ptr.vmem [resolvable:$true] %s16_s13 }
   0x3   :  { %19 = dma.hbm_to_vmem [thread:$0]  %s15_s11, 64, %s17_s13, [#allocation3]  }
   0x4   :  { %104 = dma.done.wait [#allocation3], 64  }
   0x5   :  { %105 = vsyncadd [#allocation3], 4294967232  ;;  %v27_v0 = vld [vmem:[%s135_s1] sm:$0x3]  ;;  %vm32_vm0 = vcmask 1041408   ;;  %s109_s16 = smov [#allocation5]  }
   0x6   :  { %v29_v1 = vperm.slane %v27_v0, 0  ;;  %v30_v2 = vperm.slane %v27_v0, 1  ;;  %v26_v3 = vld [vmem:[#allocation2] sm:$0xf]  ;;  %s42_s17 = sshll.u32 %s109_s16, 4  ;;  %s44_s19 = sshll.u32 %s136_s2, 4  ;;  %s43_s17 = int_to_ptr.vmem [resolvable:$true] %s42_s17  ;;  %s45_s19 = int_to_ptr.hbm [resolvable:$true] %s44_s19 }
   0x8   :  { %v31_v4 = vrot.slane %v30_v2, 6 }
   0xa   :  { %v33_v5 = vsel %vm32_vm0, %v29_v1, %v31_v4 }
   0xb   :  { %v35_v6 = vadd.f32 %v33_v5, %v26_v3 }
   0xd   :  { %36 = vst [vmem:[#allocation5] sm:$0xf] %v35_v6 }
   0xe   :  { %47 = dma.vmem_to_hbm [thread:$0]  %s43_s17, 64, %s45_s19, [#allocation4]  }
   0xf   :  { %106 = dma.done.wait [#allocation4], 64  }
  0x10   :  { %107 = vsyncadd [#allocation4], 4294967232 }
  0x11   :  { %52 = vsyncpa [#allocation3], 1 }
  0x12   :  { %53 = vsyncpa [#allocation4], 1 }

</bundles_post_ra>
